<compile_context>
chip_gen: v7x
topology: tpu7x:2x2x1
jax: 0.10.0
libtpu: 0.0.40
codegen_flags: <defaults>
</compile_context>

<pallas_src>
import jax
import jax.numpy as jnp
from jax.experimental import pallas as pl
from jax.experimental.pallas import tpu as pltpu

IN_FEATURES = 3 * 6 * 6      # 108
HIDDEN = 36
HIDDEN_PAD = 128             # hidden dim zero-padded to one full lane tile
W2_SUBLANES = 8              # fc2 "out" dim padded 1 -> 8 sublanes (rows 1..7 zero)
OUT_FEATURES = 1
_DEFAULT_TILE_B = 8192       # x tile = 8192*108*2B (bf16) ~ 1.8 MB; double-buffered
                             # + f32/bf16 h temp stays well under scoped VMEM
                             # on v5e/v6e (32 MiB default) and v7x.


def _round_up(n, m):
    return ((n + m - 1) // m) * m


def _mlp_kernel(x_ref, w1_ref, b1_ref, w2p_ref, b2_ref, o_ref):
    """One batch tile: x (tile_b, 108) -> o (1, 1, tile_b)."""
    # fc1 (MXU, f32 accumulation).  Hidden dim is zero-padded to 128 so `h`
    # is a full lane-dense tile (no masked lanes on the VPU add/ReLU path).
    h = jnp.dot(x_ref[...], w1_ref[...], preferred_element_type=jnp.float32)

    # Bias-add + ReLU epilogue runs in b1_ref's dtype: f32 exact path, or
    # bf16 on v6e/v7x bf16 activations (halves h vreg/VMEM traffic).  Then
    # cast once to the fc2 operand dtype.
    h = jnp.maximum(h.astype(b1_ref.dtype) + b1_ref[...], 0.0)
    h = h.astype(w2p_ref.dtype)                                   # (tile_b, 128)

    # fc2: contract the (padded) hidden dim, i.e. the LAST dim of BOTH
    # operands (Q·K^T style) -> the MXU consumes the transposed operand
    # natively; no XLU transpose of h is materialized.  w2p is (8, 128) with
    # only row 0 real, so both operands are fully (8,128)-aligned and the
    # (8, tile_b) result is lane-dense.
    y8 = jax.lax.dot_general(
        w2p_ref[...], h,
        dimension_numbers=(((1,), (1,)), ((), ())),
        preferred_element_type=jnp.float32)                       # (8, tile_b)
    y = jnp.maximum(y8[0:1, :] + b2_ref[0], 0.0)                  # (1, tile_b)

    o_ref[...] = y.reshape(1, 1, -1).astype(o_ref.dtype)          # (1, 1, tile_b)


def init_torch_layout_params(key):
    """PyTorch-layout params (weight (out, in), bias (out,)) with the default
    nn.Linear init U(-1/sqrt(fan_in), 1/sqrt(fan_in))."""
    k1, k2, k3, k4 = jax.random.split(key, 4)
    bound1 = 1.0 / jnp.sqrt(float(IN_FEATURES))
    bound2 = 1.0 / jnp.sqrt(float(HIDDEN))
    w1_t = jax.random.uniform(k1, (HIDDEN, IN_FEATURES), jnp.float32, -bound1, bound1)
    b1_t = jax.random.uniform(k2, (HIDDEN,), jnp.float32, -bound1, bound1)
    w2_t = jax.random.uniform(k3, (OUT_FEATURES, HIDDEN), jnp.float32, -bound2, bound2)
    b2_t = jax.random.uniform(k4, (OUT_FEATURES,), jnp.float32, -bound2, bound2)
    return w1_t, b1_t, w2_t, b2_t


def prepare_params(w1_t, b1_t, w2_t, b2_t):
    """Convert PyTorch-layout params to the padded kernel layout:
       w1k: (108, 128)  fc1 weight transposed to (in, out), hidden padded 36->128 with zeros
       b1k: (1, 128)    fc1 bias, zero-padded
       w2k: (8, 128)    fc2 weight in (out, in) layout, out padded 1->8, in padded 36->128
       b2k: (1,)        fc2 bias scalar (kernel keeps it in SMEM)
    Zero padding is exact: padded hidden units are relu(0 + 0) = 0 and their
    fc2 weights are 0, so they contribute nothing to the output."""
    w1k = jnp.zeros((IN_FEATURES, HIDDEN_PAD), jnp.float32)
    w1k = w1k.at[:, :HIDDEN].set(w1_t.T.astype(jnp.float32))
    b1k = jnp.zeros((1, HIDDEN_PAD), jnp.float32)
    b1k = b1k.at[0, :HIDDEN].set(b1_t.astype(jnp.float32))
    w2k = jnp.zeros((W2_SUBLANES, HIDDEN_PAD), jnp.float32)
    w2k = w2k.at[0, :HIDDEN].set(w2_t.reshape(-1).astype(jnp.float32))
    b2k = jnp.reshape(b2_t, (1,)).astype(jnp.float32)
    return w1k, b1k, w2k, b2k


def _is_v5_device():
    try:
        return "v5" in jax.devices()[0].device_kind.lower()
    except Exception:
        return False


def _epilogue_dtype(compute_dtype):
    """bf16 bias-add/ReLU on chips with a bf16 VALU (v6e/v7x); f32 on v5e or
    when the activations are f32."""
    if compute_dtype == jnp.bfloat16 and not _is_v5_device():
        return jnp.bfloat16
    return jnp.float32


def _pick_tile_b(requested, B):
    """Tile-size policy (perf review):
       * round to a multiple of 128 for lane-dense (unmasked) output stores;
       * never larger than the 128-padded batch;
       * cap at ceil(B/2) rounded to 128 so the grid keeps >= 2 steps when B
         allows, feeding both v7x TensorCores via the parallel batch axis."""
    desired = _round_up(max(int(requested), 128), 128)
    b_pad = _round_up(B, 128)
    two_way = _round_up(-(-B // 2), 128)
    return max(128, min(desired, b_pad, two_way))


def neural_net_forward(x, params, *, tile_b=_DEFAULT_TILE_B):
    """Forward pass.

    x      : (B, 108), bfloat16 (recommended: halves HBM reads on this
             bandwidth-bound kernel, mandatory-worthwhile on v5e) or float32
             (original nn.Linear semantics).  Matmuls accumulate in f32.
    params : output of prepare_params() (padded kernel-layout weights).
    """
    w1k, b1k, w2k, b2k = params
    B = x.shape[0]
    assert x.shape == (B, IN_FEATURES), "x must be (B, 108)"

    compute_dtype = x.dtype
    epi_dtype = _epilogue_dtype(compute_dtype)
    w1k = w1k.astype(compute_dtype)              # resident weights follow x's dtype
    w2k = w2k.astype(compute_dtype)
    b1k = b1k.astype(epi_dtype)                  # drives the h epilogue dtype
    b2k = jnp.reshape(b2k, (1,)).astype(jnp.float32)

    tile_b = _pick_tile_b(tile_b, B)
    num_tiles = pl.cdiv(B, tile_b)

    # Advisory hint so XLA schedules/overlaps the custom call correctly.
    cost = pl.CostEstimate(
        flops=2 * B * IN_FEATURES * HIDDEN_PAD + 2 * B * HIDDEN_PAD * W2_SUBLANES,
        transcendentals=0,
        bytes_accessed=(B * IN_FEATURES * x.dtype.itemsize       # x read
                        + B * OUT_FEATURES * 4                   # y write
                        + w1k.size * w1k.dtype.itemsize
                        + w2k.size * w2k.dtype.itemsize
                        + b1k.size * b1k.dtype.itemsize
                        + b2k.size * 4),
    )

    out = pl.pallas_call(
        _mlp_kernel,
        out_shape=jax.ShapeDtypeStruct((num_tiles, 1, tile_b), jnp.float32),
        grid_spec=pltpu.PrefetchScalarGridSpec(
            num_scalar_prefetch=0,
            grid=(num_tiles,),                                   # tiled batch
            in_specs=[
                # x: streamed one batch tile per grid step (double-buffered).
                pl.BlockSpec((tile_b, IN_FEATURES), lambda i: (i, 0)),
                # Weights / fc1 bias: constant block index -> VMEM-resident.
                pl.BlockSpec((IN_FEATURES, HIDDEN_PAD), lambda i: (0, 0)),
                pl.BlockSpec((1, HIDDEN_PAD), lambda i: (0, 0)),
                pl.BlockSpec((W2_SUBLANES, HIDDEN_PAD), lambda i: (0, 0)),
                # fc2 bias: a single scalar -> SMEM, no padded VMEM tile/DMA.
                pl.BlockSpec(memory_space=pltpu.MemorySpace.SMEM),
            ],
            out_specs=pl.BlockSpec((1, 1, tile_b), lambda i: (i, 0, 0)),
        ),
        compiler_params=pltpu.CompilerParams(
            # Batch tiles are independent -> shard across both TCs on v7x.
            dimension_semantics=("parallel",),
        ),
        cost_estimate=cost,
    )(x, w1k, b1k, w2k, b2k)

    # (num_tiles, 1, tile_b) lane-dense output -> (B, 1); drops the padded
    # tail rows of the final (possibly partial) tile.
    return out.reshape(-1)[:B].reshape(B, OUT_FEATURES)


def reference_forward(x, w1_t, b1_t, w2_t, b2_t, epi_dtype=jnp.float32):
    """Pure-JAX reference in PyTorch layout, mirroring the kernel's compute
    dtype (operands in x.dtype, f32 MXU accumulation, epilogue in epi_dtype)."""
    dt = x.dtype
    hp = jax.lax.Precision.HIGHEST
    h = jnp.dot(x, w1_t.T.astype(dt), precision=hp,
                preferred_element_type=jnp.float32)
    h = jnp.maximum(h.astype(epi_dtype) + b1_t.astype(epi_dtype), 0.0).astype(dt)
    y = jnp.dot(h, w2_t.T.astype(dt), precision=hp,
                preferred_element_type=jnp.float32)
    y = jnp.maximum(y + b2_t.astype(jnp.float32), 0.0)
    return y


if __name__ == "__main__":
    key = jax.random.PRNGKey(0)
    kx, kp = jax.random.split(key)

    # Small demo batch.  With the default tile policy B=300 -> tile_b=256,
    # num_tiles=2 with a ragged (padded) final tile, exercising the tiled,
    # two-step "parallel" pipeline path.
    B = 300
    x_f32 = jax.random.normal(kx, (B, IN_FEATURES), jnp.float32)

    torch_params = init_torch_layout_params(kp)   # PyTorch layout (out, in)/(out,)
    params = prepare_params(*torch_params)        # padded kernel layout

    # (1) bf16 activations: the performance-recommended path (halves HBM
    #     reads).  The reference mirrors the kernel's epilogue dtype.
    x_bf16 = x_f32.astype(jnp.bfloat16)
    out_bf16 = jax.block_until_ready(neural_net_forward(x_bf16, params))
    ref_bf16 = reference_forward(x_bf16, *torch_params,
                                 epi_dtype=_epilogue_dtype(jnp.bfloat16))
    assert out_bf16.shape == (B, OUT_FEATURES)
    assert jnp.allclose(out_bf16, ref_bf16, atol=2e-2, rtol=2e-2), "bf16 path mismatch"

    # (2) f32 activations: original nn.Linear semantics.  Loose tolerance only
    #     because XLA's default f32 matmul precision on TPU may differ from
    #     the kernel's f32 MXU accumulation.
    out_f32 = jax.block_until_ready(neural_net_forward(x_f32, params))
    ref_f32 = reference_forward(x_f32, *torch_params, epi_dtype=jnp.float32)
    assert out_f32.shape == (B, OUT_FEATURES)
    assert jnp.allclose(out_f32, ref_f32, atol=5e-2, rtol=5e-2), "f32 path mismatch"

    print("KERNEL_OK")
</pallas_src>

<mosaic_0001>
module attributes {stable_mosaic.version = 11 : i64} {
  func.func @_mlp_kernel(%arg0: i32, %arg1: memref<256x108xbf16, #tpu.memory_space<vmem>>, %arg2: memref<108x128xbf16, #tpu.memory_space<vmem>>, %arg3: memref<1x128xbf16, #tpu.memory_space<vmem>>, %arg4: memref<8x128xbf16, #tpu.memory_space<vmem>>, %arg5: memref<1xf32, #tpu.memory_space<smem>>, %arg6: memref<1x1x256xf32, #tpu.memory_space<vmem>>) attributes {dimension_semantics = [#tpu.dimension_semantics<parallel>], iteration_bounds = array<i64: 2>, scalar_prefetch = 0 : i64, scratch_operands = 0 : i64, tpu.core_type = #tpu.core_type<tc>, window_params = [{transform_indices = @transform_0, window_bounds = array<i64: 256, 108>}, {pipeline_mode = #tpu.pipeline_mode<synchronous>, transform_indices = @transform_1, window_bounds = array<i64: 108, 128>}, {pipeline_mode = #tpu.pipeline_mode<synchronous>, transform_indices = @transform_2, window_bounds = array<i64: 1, 128>}, {pipeline_mode = #tpu.pipeline_mode<synchronous>, transform_indices = @transform_3, window_bounds = array<i64: 8, 128>}, {transform_indices = @transform_4, window_bounds = array<i64: 1>}, {transform_indices = @transform_5, window_bounds = array<i64: 1, 1, 256>}]} {
    %c0 = arith.constant 0 : index
    %c0_0 = arith.constant 0 : index
    %0 = vector.load %arg1[%c0, %c0_0] : memref<256x108xbf16, #tpu.memory_space<vmem>>, vector<256x108xbf16>
    %c0_1 = arith.constant 0 : index
    %c0_2 = arith.constant 0 : index
    %1 = vector.load %arg2[%c0_1, %c0_2] : memref<108x128xbf16, #tpu.memory_space<vmem>>, vector<108x128xbf16>
    %cst = arith.constant dense<0.000000e+00> : vector<256x128xf32>
    %2 = tpu.matmul %0, %1, %cst {dimension_numbers = #tpu.dot_dimension_numbers<[1], [0], [0], [1], [0, 0, 1, 1], [], []>} : vector<256x108xbf16>, vector<108x128xbf16>, vector<256x128xf32> -> vector<256x128xf32>
    %3 = arith.truncf %2 : vector<256x128xf32> to vector<256x128xbf16>
    %c0_3 = arith.constant 0 : index
    %c0_4 = arith.constant 0 : index
    %4 = vector.load %arg3[%c0_3, %c0_4] : memref<1x128xbf16, #tpu.memory_space<vmem>>, vector<1x128xbf16>
    %5 = vector.broadcast %4 : vector<1x128xbf16> to vector<256x128xbf16>
    %6 = arith.addf %3, %5 : vector<256x128xbf16>
    %cst_5 = arith.constant 0.000000e+00 : bf16
    %7 = vector.broadcast %cst_5 : bf16 to vector<256x128xbf16>
    %8 = arith.maximumf %6, %7 : vector<256x128xbf16>
    %c0_6 = arith.constant 0 : index
    %c0_7 = arith.constant 0 : index
    %9 = vector.load %arg4[%c0_6, %c0_7] : memref<8x128xbf16, #tpu.memory_space<vmem>>, vector<8x128xbf16>
    %cst_8 = arith.constant dense<0.000000e+00> : vector<8x256xf32>
    %10 = tpu.matmul %9, %8, %cst_8 {dimension_numbers = #tpu.dot_dimension_numbers<[1], [1], [0], [0], [0, 0, 1, 0], [], []>} : vector<8x128xbf16>, vector<256x128xbf16>, vector<8x256xf32> -> vector<8x256xf32>
    %11 = vector.extract_strided_slice %10 {offsets = [0, 0], sizes = [1, 256], strides = [1, 1]} : vector<8x256xf32> to vector<1x256xf32>
    %c0_9 = arith.constant 0 : index
    %12 = memref.load %arg5[%c0_9] : memref<1xf32, #tpu.memory_space<smem>>
    %13 = vector.broadcast %12 : f32 to vector<1x256xf32>
    %14 = arith.addf %11, %13 : vector<1x256xf32>
    %cst_10 = arith.constant 0.000000e+00 : f32
    %15 = vector.broadcast %cst_10 : f32 to vector<1x256xf32>
    %16 = arith.maximumf %14, %15 : vector<1x256xf32>
    %17 = vector.shape_cast %16 : vector<1x256xf32> to vector<1x1x256xf32>
    %c0_11 = arith.constant 0 : index
    %c0_12 = arith.constant 0 : index
    %c0_13 = arith.constant 0 : index
    %18 = vector.load %arg6[%c0_11, %c0_12, %c0_13] : memref<1x1x256xf32, #tpu.memory_space<vmem>>, vector<1x1x256xf32>
    tpu.vector_store %arg6[%c0_11, %c0_12, %c0_13], %17 {strides = array<i32>} : memref<1x1x256xf32, #tpu.memory_space<vmem>>, vector<1x1x256xf32>,
    return
  }
  func.func @transform_0(%arg0: i32) -> (i32, i32) {
    %c0_i32 = arith.constant 0 : i32
    %c0_i32_0 = arith.constant 0 : i32
    return %arg0, %c0_i32 : i32, i32
  }
  func.func @transform_1(%arg0: i32) -> (i32, i32) {
    %c0_i32 = arith.constant 0 : i32
    %c0_i32_0 = arith.constant 0 : i32
    %c0_i32_1 = arith.constant 0 : i32
    return %c0_i32, %c0_i32_0 : i32, i32
  }
  func.func @transform_2(%arg0: i32) -> (i32, i32) {
    %c0_i32 = arith.constant 0 : i32
    %c0_i32_0 = arith.constant 0 : i32
    %c0_i32_1 = arith.constant 0 : i32
    return %c0_i32, %c0_i32_0 : i32, i32
  }
  func.func @transform_3(%arg0: i32) -> (i32, i32) {
    %c0_i32 = arith.constant 0 : i32
    %c0_i32_0 = arith.constant 0 : i32
    %c0_i32_1 = arith.constant 0 : i32
    return %c0_i32, %c0_i32_0 : i32, i32
  }
  func.func @transform_4(%arg0: i32) -> i32 {
    %c0_i32 = arith.constant 0 : i32
    %c0_i32_0 = arith.constant 0 : i32
    return %c0_i32 : i32
  }
  func.func @transform_5(%arg0: i32) -> (i32, i32, i32) {
    %c0_i32 = arith.constant 0 : i32
    %c0_i32_0 = arith.constant 0 : i32
    %c0_i32_1 = arith.constant 0 : i32
    return %arg0, %c0_i32, %c0_i32_0 : i32, i32, i32
  }
}

</mosaic_0001>

<bundles_post_ra>
// kernel: tpu_custom_call.1
= control target key start
LH: loop header
LB: loop body
LE: loop exit
PB: predicated region body
PF: predicated region fallthrough
CT: control target
= control target key end

     0   :  { %s1585_s0 = inlined_call_operand.hbm [shape: bf16[300,108], index: 0, kind: input, shape index: {}]   ;;  %s1586_s1 = inlined_call_operand.hbm [shape: bf16[108,128], index: 1, kind: input, shape index: {}]   ;;  %s1587_s2 = inlined_call_operand.vmem [shape: bf16[1,128], index: 2, kind: input, shape index: {}]   ;;  %s1588_s3 = inlined_call_operand.vmem [shape: bf16[8,128], index: 3, kind: input, shape index: {}]   ;;  %s1589_s4 = inlined_call_operand.<no memory space> [shape: f32[1], index: 4, kind: input, shape index: {}]   ;;  %s1590_s5 = inlined_call_operand.hbm [shape: f32[2,1,256], index: 5, kind: output, shape index: {}]  }
   0x1   :  { %10 = sst [smem:[#allocation2]] %s1589_s4 }
   0x2   :  { %11 = vsyncpa [#allocation4], 0 }
   0x3   :  { %13 = vsyncpa [#allocation4 + $0x1], 0 }
   0x4   :  { %14 = vsyncpa [#allocation7], 0 }
   0x5   :  { %15 = vsyncpa [#allocation5], 0 }
   0x6   :  { %17 = vsyncpa [#allocation5 + $0x1], 0  ;;  %s1273_s20 = smov 0   ;;  %s1275_s21 = smov 0  }
   0x7   :  { %s1277_s22 = smov 0   ;;  %s1279_s23 = smov 0  }
   0x8 LB: > { %s1294_s4 = sadd.s32 4294967295, %s1229_s23   ;;  %s874_s24 = sadd.s32 4294967294, %s1229_s23   ;;  %s1229_s23 = sphi %s1279_s23, %s1611_s23   ;;  %s1225_s22 = sphi %s1277_s22, %s1610_s22   ;;  %s1221_s21 = sphi %s1275_s21, %s1609_s21   ;;  %s1217_s20 = sphi %s1273_s20, %s1608_s20  }
   0x9   : > { %s1298_s25 = sadd.s32 1, %s1229_s23   ;;  %s30_s26 = sadd.s32 1, %s1225_s22 }
   0xa   : > { %s27_s27 = ssub.s32 %s1229_s23, %s1298_s25  ;;  %p37_p0 = scmp.ne.s32.totalorder %s1225_s22, %s1221_s21 }
   0xb   : > { %p28_p1 = scmp.eq.s32.totalorder %s27_s27, 0  ;;  %p38_p2 = scmp.eq.s32.totalorder %s1229_s23, 0 }
   0xc   : > { %p43_p3 = scmp.ne.s32.totalorder %s1221_s21, %s1217_s20  ;;  %p1591_p4 = scmp.eq.s32.totalorder %s1294_s4, 0 }
   0xd   : > { %s1310_s28 = scalar_select %p28_p1, %s1225_s22, %s30_s26  }
   0xe   : > { %p1312_p5 = por %p38_p2, %p37_p0  ;;  %p1318_p6 = por %p1591_p4, %p43_p3 }
   0xf   : > { %p151_p7 = scmp.eq.s32.totalorder %s1294_s4, 1  ;;  %p157_p8 = scmp.eq.s32.totalorder %s874_s24, 1 }
  0x10   : > { %s1595_s29 = scalar_select %p1312_p5, 1, 0 }
  0x11   : > { %s1596_s30 = scalar_select %p1318_p6, 1, 0 }
  0x12   : > { %p875_p9 = scmp.ge.s32.totalorder %s1229_s23, 1  ;;  %p164_p10 = scmp.lt.s32.totalorder %s1229_s23, 3 }
  0x13   : > { %p1325_p11 = por %p151_p7, %p37_p0  ;;  %p1329_p12 = por %p157_p8, %p43_p3 }
  0x14   : > { %p1333_p13 = pnand %p875_p9, %p164_p10  ;;  %s1231_s9 = smov [#allocation6]  }
  0x15   : > { %s1597_s6 = scalar_select %p1325_p11, 1, 0 }
  0x16   : > { %s1598_s7 = scalar_select %p1329_p12, 1, 0 }
  0x17   : > { %s1599_s8 = scalar_select %p1333_p13, 1, 0 }
  0x18   : > { %p1030_p1 = pneg %p1333_p13  ;;  %s176_s10 = sshll.u32 %s1231_s9, 4  ;;  %s177_s10 = int_to_ptr.vmem [resolvable:$true] %s176_s10 }
  0x19   : > { %s1103_s14 = scalar_lea.hbm %s1586_s1, 896 }
  0x1a   : > { %p1341_p2 = pnand %p1030_p1, %p1591_p4  ;;  %p1104_p0 = scmp.ne.s32.totalorder %s1586_s1, %s1103_s14 }
  0x1b   : > { %p1110_p9 = scmp.lt.u32.totalorder %s1103_s14, %s1586_s1 }
  0x1c   : > { %p1105_p3 = pneg %p1341_p2 }
  0x1e   : > { %p1106_p7 = pnand %p1105_p3, %p1104_p0 }
  0x20   : > { %p1107_p8 = pneg %p1106_p7 }
  0x22   : > { %p1112_p10 = pnand %p1110_p9, %p1107_p8 }
  0x24   : > { %1115 = shalt.err (!%p1112_p10)
}
  0x25   : > { %s1116_s19 = scalar_lea.vmem %s177_s10, 896  ;;  %p1124_p11 = scmp.lt.s32.totalorder %s177_s10, %s177_s10 }
  0x26   : > { %p1117_p1 = scmp.ne.s32.totalorder %s177_s10, %s1116_s19  ;;  %p1125_p6 = scmp.lt.s32.totalorder %s1116_s19, %s1116_s19 }
  0x28   : > { %p1119_p4 = pnand %p1117_p1, %p1105_p3  ;;  %p1126_p13 = por %p1125_p6, %p1124_p11 }
  0x2a   : > { %p1120_p12 = pneg %p1119_p4 }
  0x2c   : > { %p1127_p5 = pnand %p1126_p13, %p1120_p12 }
  0x2e   : > { %1130 = shalt.err (!%p1127_p5)
}
  0x2f   : > { %s1232_s24 = smov 64   ;;  %s1233_s26 = smov 4  }
  0x30   : > { %1033 = dma.hbm_to_vmem [thread:$0]  (!%p1341_p2), %s1586_s1, 896, %s177_s10, [#allocation7], %s1232_s24, %s1232_s24, %s1233_s26  }
  0x31   : > { %p877_p0 = scmp.ge.s32.totalorder %s1229_s23, 2 }
  0x32   : > { %p1601_p4 = scmp.ne.s32.totalorder (!%p877_p0), %s1595_s29, 0 }
  0x33   : > { %195 = sbr.rel (%p877_p0) target bundleno = 93 (0x5d), region = 32 }
  0x3a   : > { %198 = sbr.rel (!%p1601_p4) target bundleno = 93 (0x5d), region = 36  ;;  %s199_s12 = sand.u32 (%p1601_p4), 1, %s1225_s22  }
  0x3b   : > { %s879_s13 = sshll.u32 (%p1601_p4), %s1229_s23, 5  ;;  %s878_s14 = sshll.u32 (%p1601_p4), %s199_s12, 7 }
  0x3c   : > { %s205_s15 = ssub.s32 (%p1601_p4), 38, %s879_s13  ;;  %s1371_s16 = scalar_lea.sflag (%p1601_p4), [#allocation4], %s199_s12 }
  0x3d   : > { %p206_p5 = scmp.lt.s32.totalorder (%p1601_p4), %s205_s15, 32  ;;  %s203_s17 = scalar_lea.vmem (%p1601_p4), [#allocation3], %s878_s14 }
  0x41   : > { %s1613_s15 = smov (!%p206_p5, %s205_s15), 32 }
  0x42   : > { %s1368_s11 = sshll.u32 %s1613_s15, 6 }
  0x43   : > { %s210_s10 = ssub.s32 2048, %s1368_s11 }
  0x44   : > { %211 = vsyncadd %s1371_s16, %s210_s10  ;;  %p881_p6 = scmp.ne.s32.totalorder %s1368_s11, 0  ;;  %s933_s29 = sshll.u32 %s1229_s23, 11 }
  0x45   : > { %s1379_s24 = scalar_lea.hbm %s1585_s0, %s933_s29  ;;  %s216_s26 = sshll.u32 %s203_s17, 4  ;;  %s1381_s26 = int_to_ptr.vmem [resolvable:$true] %s216_s26 }
  0x46   : > { %s1131_s27 = scalar_lea.hbm %s1379_s24, %s1368_s11  ;;  %s1135_s13 = scalar_lea.hbm %s1585_s0, 2432 }
  0x47   : > { %p1132_p11 = scmp.ne.s32.totalorder %s1379_s24, %s1131_s27  ;;  %p1136_p2 = scmp.lt.u32.totalorder %s1379_s24, %s1585_s0 }
  0x48   : > { %p1137_p3 = scmp.lt.u32.totalorder %s1135_s13, %s1131_s27  ;;  %p1139_p8 = scmp.lt.u32.totalorder %s1131_s27, %s1379_s24 }
  0x49   : > { %p1133_p12 = pnand %p1132_p11, %p881_p6 }
  0x4a   : > { %p1138_p7 = por %p1137_p3, %p1136_p2 }
  0x4b   : > { %p1134_p13 = pneg %p1133_p12 }
  0x4c   : > { %p1140_p9 = por %p1139_p8, %p1138_p7 }
  0x4e   : > { %p1141_p10 = pnand %p1140_p9, %p1134_p13 }
  0x50   : > { %1144 = shalt.err (!%p1141_p10)
}
  0x51   : > { %s1145_s10 = scalar_lea.vmem %s1381_s26, %s1368_s11  ;;  %s1234_s17 = smov [#allocation3]  }
  0x52   : > { %p1146_p1 = scmp.ne.s32.totalorder %s1381_s26, %s1145_s10  ;;  %s1149_s29 = sshll.u32 %s1234_s17, 4  ;;  %s1150_s29 = int_to_ptr.vmem [resolvable:$false] %s1149_s29 }
  0x53   : > { %s1151_s18 = scalar_lea.vmem %s1150_s29, 4096  ;;  %p1152_p11 = scmp.lt.s32.totalorder %s1381_s26, %s1150_s29 }
  0x54   : > { %p1147_p4 = pnand %p1146_p1, %p881_p6  ;;  %p1153_p12 = scmp.lt.s32.totalorder %s1151_s18, %s1145_s10 }
  0x56   : > { %p1148_p5 = pneg %p1147_p4  ;;  %p1154_p2 = por %p1153_p12, %p1152_p11 }
  0x58   : > { %p1155_p3 = pnand %p1154_p2, %p1148_p5 }
  0x5a   : > { %1158 = shalt.err (!%p1155_p3)
}
  0x5b   : > { %s1235_s19 = smov 64   ;;  %s1236_s27 = smov 4  }
  0x5c   : > { %222 = dma.hbm_to_vmem [thread:$0]  (%p881_p6), %s1379_s24, %s1368_s11, %s1381_s26, %s1371_s16, %s1235_s19, %s1235_s19, %s1236_s27  }
  0x5d PF: > { %p1602_p13 = scmp.ne.s32.totalorder %s1599_s8, 0 }
  0x5e   : > { %s1411_s9 = sand.u32 (!%p1602_p13), 1, %s1221_s21   ;;  %p1603_p7 = scmp.ne.s32.totalorder (!%p1602_p13), %s1596_s30, 0 }
  0x5f   : > { %228 = sbr.rel (%p1602_p13) target bundleno = 689 (0x2b1), region = 40  ;;  %s886_s12 = sshll.u32 (!%p1602_p13), %s1411_s9, 7 }
  0x60   : > { %s231_s13 = scalar_lea.sflag (!%p1602_p13), [#allocation4], %s1411_s9  ;;  %s1415_s14 = scalar_lea.vmem (!%p1602_p13), [#allocation3], %s886_s12 }
  0x66   : > { %1204 = dma.done.wait (%p1603_p7), %s231_s13, 2048  }
  0x67   : > { %1206 = vsyncadd (%p1603_p7), %s231_s13, 4294965248  ;;  %p1604_p6 = scmp.eq.s32.totalorder %s1294_s4, 0 }
  0x69   : > { %1208 = dma.done.wait (%p1604_p6), [#allocation7], 896   ;;  %p1605_p8 = pmov %p1604_p6 }
  0x6a   : > { %v1080_v0 = vld [vmem:[#allocation6] sm:$0xff]   ;;  %v1081_v1 = vld [vmem:[#allocation6 + $0x8] sm:$0xff]   ;;  %v1082_v2 = vld [vmem:[#allocation6 + $0x10] sm:$0xff]   ;;  %vm438_vm0 = vcmask 883712   ;;  %vm487_vm1 = vcmask 1045504   ;;  %v672_v43 = vlaneseq  ;;  %s750_s24 = sld [smem:[#allocation2]] }
  0x6b   : > { %1210 = vsyncadd (%p1605_p8), [#allocation7], 4294966400  ;;  %976 = vmatprep.subr.bf16.mxu0 %v1080_v0  ;;  %v1087_v3 = vld [vmem:[%s1415_s14] sm:$0xff]   ;;  %v1083_v4 = vld [vmem:[#allocation6 + $0x18] sm:$0xff]   ;;  %s888_s26 = sshll.u32 %s1411_s9, 1  ;;  %s934_s15 = sshll.u32 %s1294_s4, 5 }
  0x6c   : > { %977 = vmatpush3.bf16.msra.mxu0 %v1080_v0  ;;  %990 = vmatprep.mubr.msk.bf16.mxu0 %vm438_vm0, %v1087_v3  ;;  %v1084_v5 = vld [vmem:[#allocation6 + $0x20] sm:$0xff]   ;;  %v1085_v6 = vld [vmem:[#allocation6 + $0x28] sm:$0xff]   ;;  %v1086_v7 = vld [vmem:[#allocation6 + $0x30] sm:$0x3f]   ;;  %v1484_v45 = vshrl.u32 %v672_v43, 7  ;;  %v1237_v0 = vmov 0   ;;  %s1541_s19 = scalar_lea.hbm %s1590_s5, %s934_s15 }
  0x6d   : > { %978 = vmatprep.subr.bf16.mxu0 %v1081_v1  ;;  %v489_v8 = vsel %vm487_vm1, %v1086_v7, 0  ;;  %v1088_v9 = vld [vmem:[%s1415_s14 + $0x8] sm:$0xff]   ;;  %v1089_v10 = vld [vmem:[%s1415_s14 + $0x10] sm:$0xff]   ;;  %v1090_v11 = vld [vmem:[%s1415_s14 + $0x18] sm:$0xff]   ;;  %s264_s10 = scalar_lea.vmem [#allocation8], %s888_s26  ;;  %vm776_vm2 = vcmp.lt.s32.totalorder %v672_v43, 256 }
  0x6e   : > { %v1091_v12 = vld [vmem:[%s1415_s14 + $0x20] sm:$0xff]   ;;  %v1092_v13 = vld [vmem:[%s1415_s14 + $0x28] sm:$0xff]   ;;  %v1093_v14 = vld [vmem:[%s1415_s14 + $0x30] sm:$0xff]   ;;  %v674_v53 = vsub.s32 0, %v1484_v45  ;;  %s794_s17 = sshll.u32 %s264_s10, 4  ;;  %s780_s27 = scalar_lea.sflag [#allocation5], %s1411_s9  ;;  %s1543_s17 = int_to_ptr.vmem [resolvable:$true] %s794_s17 }
  0x6f   : > { %v1094_v15 = vld [vmem:[%s1415_s14 + $0x38] sm:$0xff]   ;;  %v1095_v16 = vld [vmem:[%s1415_s14 + $0x40] sm:$0xff]   ;;  %v1096_v17 = vld [vmem:[%s1415_s14 + $0x48] sm:$0xff]   ;;  %s1159_s12 = scalar_lea.vmem %s1543_s17, 32  ;;  %p1606_p10 = scmp.ne.s32.totalorder %s1597_s6, 0 }
  0x70   : > { %979 = vmatpush3.bf16.msra.mxu0 %v1081_v1  ;;  %v1097_v18 = vld [vmem:[%s1415_s14 + $0x50] sm:$0xff]   ;;  %v1098_v19 = vld [vmem:[%s1415_s14 + $0x58] sm:$0xff]   ;;  %v1099_v20 = vld [vmem:[%s1415_s14 + $0x60] sm:$0xff]   ;;  %p1160_p9 = scmp.ne.s32.totalorder %s1543_s17, %s1159_s12  ;;  %s1239_s4 = smov [#allocation8]  }
  0x71   : > { %980 = vmatprep.subr.bf16.mxu0 %v1082_v2  ;;  %v1100_v21 = vld [vmem:[%s1415_s14 + $0x68] sm:$0xff]   ;;  %v1101_v22 = vld [vmem:[%s1415_s14 + $0x70] sm:$0xff]   ;;  %v1102_v23 = vld [vmem:[%s1415_s14 + $0x78] sm:$0xff]   ;;  %s1163_s13 = sshll.u32 %s1239_s4, 4  ;;  %s1164_s13 = int_to_ptr.vmem [resolvable:$false] %s1163_s13 }
  0x72   : > { %v1460_v24 = vld [vmem:[%s1588_s3] sm:$0xf]  ;;  %p1161_p1 = pnand %p1160_p9, %p1606_p10  ;;  %s1165_s14 = scalar_lea.vmem %s1164_s13, 64 }
  0x73   : > { %974 = vmatprep.mubr.bf16.mxu1 %v1460_v24  ;;  %v668_v47 = vld [vmem:[%s1587_s2] sm:$0x1]  ;;  %p1166_p5 = scmp.lt.s32.totalorder %s1543_s17, %s1164_s13  ;;  %p1167_p11 = scmp.lt.s32.totalorder %s1165_s14, %s1159_s12 }
  0x74   : > { %981 = vmatpush3.bf16.msra.mxu0 %v1082_v2  ;;  %v670_v52 = vpack.i.b16 %v668_v47, %v668_v47  ;;  %p1162_p4 = pneg %p1161_p1 }
  0x75   : > { %982 = vmatprep.subr.bf16.mxu0 %v1083_v4  ;;  %p1168_p12 = por %p1167_p11, %p1166_p5 }
  0x76   : > { %v1500_v55 = vrot.slane %v670_v52, %v674_v53 }
  0x77   : > { %p1169_p2 = pnand %p1168_p12, %p1162_p4 }
  0x78   : > { %983 = vmatpush3.bf16.msra.mxu0 %v1083_v4 }
  0x79   : > { %984 = vmatprep.subr.bf16.mxu0 %v1084_v5 }
  0x7c   : > { %985 = vmatpush3.bf16.msra.mxu0 %v1084_v5 }
  0x7d   : > { %986 = vmatprep.subr.bf16.mxu0 %v1085_v6 }
  0x80   : > { %987 = vmatpush3.bf16.msra.mxu0 %v1085_v6 }
  0x81   : > { %1022 = vmatprep.subr.msk.bf16.mxu0 %vm487_vm1, %v1086_v7 }
  0x84   : > { %989 = vmatpush3.bf16.msra.mxu0 %v489_v8 }
  0x87   : > { %991 = vmatmul.mubr.msk.bf16.vlgmr.msra.gmra.mrb[0].mxu0 %vm438_vm0, %v1088_v9 }
  0x88   : > { %994 = vmatprep.mubr.msk.bf16.mxu0 %vm438_vm0, %v1089_v10 }
  0x8f   : > { %995 = vmatmul.mubr.msk.bf16.gmra.mrb[4].mxu0 %vm438_vm0, %v1090_v11 }
  0x90   : > { %998 = vmatprep.mubr.msk.bf16.mxu0 %vm438_vm0, %v1091_v12 }
  0x97   : > { %999 = vmatmul.mubr.msk.bf16.gmra.mrb[8].mxu0 %vm438_vm0, %v1092_v13 }
  0x98   : > { %1002 = vmatprep.mubr.msk.bf16.mxu0 %vm438_vm0, %v1093_v14 }
  0x9f   : > { %1003 = vmatmul.mubr.msk.bf16.gmra.mrb[12].mxu0 %vm438_vm0, %v1094_v15 }
  0xa0   : > { %1006 = vmatprep.mubr.msk.bf16.mxu0 %vm438_vm0, %v1095_v16 }
  0xa7   : > { %1007 = vmatmul.mubr.msk.bf16.gmra.mrb[16].mxu0 %vm438_vm0, %v1096_v17 }
  0xa8   : > { %1010 = vmatprep.mubr.msk.bf16.mxu0 %vm438_vm0, %v1097_v18 }
  0xaf   : > { %1011 = vmatmul.mubr.msk.bf16.gmra.mrb[20].mxu0 %vm438_vm0, %v1098_v19 }
  0xb0   : > { %1014 = vmatprep.mubr.msk.bf16.mxu0 %vm438_vm0, %v1099_v20 }
  0xb7   : > { %1015 = vmatmul.mubr.msk.bf16.gmra.mrb[24].mxu0 %vm438_vm0, %v1100_v21 }
  0xb8   : > { %1018 = vmatprep.mubr.msk.bf16.mxu0 %vm438_vm0, %v1101_v22 }
  0xbf   : > { %1019 = vmatmul.mubr.msk.bf16.gmra.mrb[28].mxu0 %vm438_vm0, %v1102_v23 }
 0x15a   : > { %v992_v25 = vpop.f32.mrb[0].mxu0 }
 0x15b   : > { %v525_v26 = vpop.f32.mrb[1].mxu0 }
 0x15c   : > { %v993_v27 = vpop.f32.mrb[2].mxu0 }
 0x15d   : > { %v653_v28 = vpack.c.bf16 %v993_v27, %v992_v25  ;;  %v528_v29 = vpop.f32.mrb[3].mxu0 }
 0x15e   : > { %v652_v30 = vpack.c.bf16 %v528_v29, %v525_v26 }
 0x15f   : > { %v677_v10 = vadd.bf16 %v1500_v55, %v653_v28 }
 0x160   : > { %v676_v61 = vadd.bf16 %v1500_v55, %v652_v30 }
 0x161   : > { %v693_v14 = vmax.bf16 %v1237_v0, %v677_v10 }
 0x162   : > { %v1463_v31 = vpop.f32.mrb[4].mxu0  ;;  %v692_v3 = vmax.bf16 %v1237_v0, %v676_v61 }
 0x163   : > { %v541_v32 = vpop.f32.mrb[5].mxu0 }
 0x164   : > { %v1465_v33 = vpop.f32.mrb[6].mxu0 }
 0x165   : > { %v655_v34 = vpack.c.bf16 %v1465_v33, %v1463_v31  ;;  %v544_v35 = vpop.f32.mrb[7].mxu0 }
 0x166   : > { %v654_v36 = vpack.c.bf16 %v544_v35, %v541_v32 }
 0x167   : > { %v679_v35 = vadd.bf16 %v1500_v55, %v655_v34 }
 0x168   : > { %v678_v20 = vadd.bf16 %v1500_v55, %v654_v36 }
 0x169   : > { %v695_v47 = vmax.bf16 %v1237_v0, %v679_v35 }
 0x16a   : > { %v1469_v37 = vpop.f32.mrb[8].mxu0  ;;  %v694_v23 = vmax.bf16 %v1237_v0, %v678_v20 }
 0x16b   : > { %v1471_v38 = vpop.f32.mrb[9].mxu0 }
 0x16c   : > { %v1473_v39 = vpop.f32.mrb[10].mxu0 }
 0x16d   : > { %v657_v40 = vpack.c.bf16 %v1473_v39, %v1469_v37  ;;  %v1477_v41 = vpop.f32.mrb[11].mxu0 }
 0x16e   : > { %v656_v42 = vpack.c.bf16 %v1477_v41, %v1471_v38 }
 0x16f   : > { %v681_v31 = vadd.bf16 %v1500_v55, %v657_v40  ;;  %v1238_v40 = vmov 1966171168  }
 0x170   : > { %v680_v52 = vadd.bf16 %v1500_v55, %v656_v42 }
 0x171   : > { %v697_v34 = vmax.bf16 %v1237_v0, %v681_v31 }
 0x172   : > { %v1481_v44 = vpop.f32.mrb[12].mxu0 }
 0x173   : > { %v1486_v46 = vpop.f32.mrb[13].mxu0 }
 0x174   : > { %v1491_v48 = vpop.f32.mrb[14].mxu0 }
 0x175   : > { %v659_v49 = vpack.c.bf16 %v1491_v48, %v1481_v44  ;;  %v1495_v50 = vpop.f32.mrb[15].mxu0 }
 0x176   : > { %v658_v51 = vpack.c.bf16 %v1495_v50, %v1486_v46  ;;  %v760_v46 = vunpack.c.l.s4 %v1238_v40  ;;  %v751_v50 = vstv %s750_s24 }
 0x177   : > { %v683_v37 = vadd.bf16 %v1500_v55, %v659_v49 }
 0x178   : > { %v682_v38 = vadd.bf16 %v1500_v55, %v658_v51 }
 0x179   : > { %v699_v39 = vmax.bf16 %v1237_v0, %v683_v37 }
 0x17a   : > { %v1008_v54 = vpop.f32.mrb[16].mxu0  ;;  %v698_v42 = vmax.bf16 %v1237_v0, %v682_v38 }
 0x17b   : > { %v589_v56 = vpop.f32.mrb[17].mxu0 }
 0x17c   : > { %v1009_v57 = vpop.f32.mrb[18].mxu0 }
 0x17d   : > { %v661_v58 = vpack.c.bf16 %v1009_v57, %v1008_v54  ;;  %v592_v59 = vpop.f32.mrb[19].mxu0  ;;  %v696_v54 = vmax.bf16 %v1237_v0, %v680_v52 }
 0x17e   : > { %v660_v60 = vpack.c.bf16 %v592_v59, %v589_v56  ;;  %v761_v59 = vunpack.c.0.s8 %v760_v46 }
 0x17f   : > { %v685_v62 = vadd.bf16 %v1500_v55, %v661_v58 }
 0x180   : > { %v684_v63 = vadd.bf16 %v1500_v55, %v660_v60 }
 0x181   : > { %v701_v5 = vmax.bf16 %v1237_v0, %v685_v62 }
 0x182   : > { %v700_v1 = vmax.bf16 %v1237_v0, %v684_v63  ;;  %v1012_v2 = vpop.f32.mrb[20].mxu0 }
 0x183   : > { %v605_v4 = vpop.f32.mrb[21].mxu0 }
 0x184   : > { %958 = vmatprep.subr.bf16.mxu1 %v700_v1  ;;  %v1013_v6 = vpop.f32.mrb[22].mxu0 }
 0x185   : > { %959 = vmatpush3.bf16.xpose.msra.mxu1 %v692_v3  ;;  %v663_v7 = vpack.c.bf16 %v1013_v6, %v1012_v2  ;;  %v608_v8 = vpop.f32.mrb[23].mxu0 }
 0x186   : > { %960 = vmatprep.subr.bf16.mxu1 %v701_v5  ;;  %v662_v9 = vpack.c.bf16 %v608_v8, %v605_v4 }
 0x187   : > { %v687_v21 = vadd.bf16 %v1500_v55, %v663_v7 }
 0x188   : > { %v686_v11 = vadd.bf16 %v1500_v55, %v662_v9 }
 0x189   : > { %v703_v26 = vmax.bf16 %v1237_v0, %v687_v21 }
 0x18a   : > { %v702_v12 = vmax.bf16 %v1237_v0, %v686_v11  ;;  %v1016_v13 = vpop.f32.mrb[24].mxu0 }
 0x18b   : > { %v621_v15 = vpop.f32.mrb[25].mxu0 }
 0x18c   : > { %v1017_v16 = vpop.f32.mrb[26].mxu0 }
 0x18d   : > { %961 = vmatpush3.bf16.xpose.msra.mxu1 %v693_v14  ;;  %v665_v17 = vpack.c.bf16 %v1017_v16, %v1016_v13  ;;  %v624_v18 = vpop.f32.mrb[27].mxu0 }
 0x18e   : > { %962 = vmatprep.subr.bf16.mxu1 %v702_v12  ;;  %v664_v19 = vpack.c.bf16 %v624_v18, %v621_v15 }
 0x18f   : > { %v689_v53 = vadd.bf16 %v1500_v55, %v665_v17 }
 0x190   : > { %v688_v30 = vadd.bf16 %v1500_v55, %v664_v19 }
 0x191   : > { %v705_v56 = vmax.bf16 %v1237_v0, %v689_v53 }
 0x192   : > { %v1020_v22 = vpop.f32.mrb[28].mxu0  ;;  %v704_v36 = vmax.bf16 %v1237_v0, %v688_v30 }
 0x193   : > { %v637_v25 = vpop.f32.mrb[29].mxu0 }
 0x194   : > { %v1021_v27 = vpop.f32.mrb[30].mxu0 }
 0x195   : > { %963 = vmatpush3.bf16.xpose.msra.mxu1 %v694_v23  ;;  %v667_v28 = vpack.c.bf16 %v1021_v27, %v1020_v22  ;;  %v640_v29 = vpop.f32.mrb[31].mxu0 }
 0x196   : > { %964 = vmatprep.subr.bf16.mxu1 %v703_v26  ;;  %v666_v32 = vpack.c.bf16 %v640_v29, %v637_v25 }
 0x197   : > { %v691_v41 = vadd.bf16 %v1500_v55, %v667_v28 }
 0x198   : > { %v690_v57 = vadd.bf16 %v1500_v55, %v666_v32  ;;  %v764_v55 = vsub.s32 %v761_v59, %v1484_v45 }
 0x199   : > { %v707_v58 = vmax.bf16 %v1237_v0, %v691_v41 }
 0x19a   : > { %v706_v33 = vmax.bf16 %v1237_v0, %v690_v57 }
 0x19d   : > { %965 = vmatpush3.bf16.xpose.msra.mxu1 %v695_v47 }
 0x19e   : > { %966 = vmatprep.subr.bf16.mxu1 %v704_v36 }
 0x1a5   : > { %967 = vmatpush3.bf16.xpose.msra.mxu1 %v696_v54 }
 0x1a6   : > { %968 = vmatprep.subr.bf16.mxu1 %v705_v56 }
 0x1ad   : > { %969 = vmatpush3.bf16.xpose.msra.mxu1 %v697_v34 }
 0x1ae   : > { %970 = vmatprep.subr.bf16.mxu1 %v706_v33 }
 0x1b5   : > { %971 = vmatpush3.bf16.xpose.msra.mxu1 %v698_v42 }
 0x1b6   : > { %972 = vmatprep.subr.bf16.mxu1 %v707_v58 }
 0x1bd   : > { %973 = vmatpush3.bf16.xpose.msra.mxu1 %v699_v39 }
 0x1c4   : > { %975 = vmatmul.mubr.bf16.vlgmr.msra.gmra.mrb[0].mxu1 %v1460_v24 }
 0x297   : > { %v743_v51 = vpop.f32.mrb[0].mxu1 }
 0x298   : > { %v752_v60 = vadd.f32 %v751_v50, %v743_v51  ;;  %v745_v61 = vpop.f32.mrb[1].mxu1 }
 0x299   : > { %v753_v62 = vadd.f32 %v751_v50, %v745_v61  ;;  %v747_v63 = vpop.f32.mrb[2].mxu1 }
 0x29a   : > { %v754_v44 = vmax.f32 %v752_v60, 0.0  ;;  %v748_v48 = vpop.f32.mrb[3].mxu1 }
 0x29b   : > { %v755_v49 = vmax.f32 %v753_v62, 0.0 }
 0x29d   : > { %v758_v24 = vcombine.low %v754_v44, %v755_v49 }
 0x29f   : > { %v765_v0 = vrot.slane %v758_v24, %v764_v55 }
 0x2a1   : > { %v772_v1 = vrot.slane %v765_v0, %v764_v55 }
 0x2a3   : > { %778 = vst.msk [vmem:[%s264_s10] sm:$0x3] %vm776_vm2, %v772_v1 }
 0x2a4   : > { %1172 = shalt.err (!%p1169_p2)
}
 0x2a5   : > { %s1173_s9 = scalar_lea.hbm %s1541_s19, 32  ;;  %s1177_s11 = scalar_lea.hbm %s1590_s5, 64 }
 0x2a6   : > { %p1174_p3 = scmp.ne.s32.totalorder %s1541_s19, %s1173_s9  ;;  %p1178_p6 = scmp.lt.u32.totalorder %s1541_s19, %s1590_s5 }
 0x2a7   : > { %p1179_p8 = scmp.lt.u32.totalorder %s1177_s11, %s1173_s9  ;;  %p1181_p1 = scmp.lt.u32.totalorder %s1173_s9, %s1541_s19 }
 0x2a8   : > { %p1175_p13 = pnand %p1174_p3, %p1606_p10 }
 0x2a9   : > { %p1180_p9 = por %p1179_p8, %p1178_p6 }
 0x2aa   : > { %p1176_p7 = pneg %p1175_p13 }
 0x2ab   : > { %p1182_p4 = por %p1181_p1, %p1180_p9 }
 0x2ad   : > { %p1183_p5 = pnand %p1182_p4, %p1176_p7 }
 0x2af   : > { %1186 = shalt.err (!%p1183_p5)
}
 0x2b0   : > { %1028 = dma.vmem_to_hbm [thread:$0]  (%p1606_p10), %s1543_s17, 32, %s1541_s19, %s780_s27  }
 0x2b1 PF: > { %s806_s26 = sand.u32 1, %s1217_s20   ;;  %p1607_p11 = scmp.ne.s32.totalorder %s1598_s7, 0 }
 0x2b2   : > { %s807_s15 = scalar_lea.sflag [#allocation5], %s806_s26 }
 0x2b3   : > { %p1035_p12 = pnand %p877_p0, %p1607_p11 }
 0x2b5   : > { %1212 = dma.done.wait (!%p1035_p12), %s807_s15, 32  }
 0x2b6   : > { %1214 = vsyncadd (!%p1035_p12), %s807_s15, 4294967264  ;;  %p20_p2 = scmp.ge.s32.totalorder %s1298_s25, 4   ;;  %s1608_s20 = smov %s1221_s21 }
 0x2b7   : > { %s1609_s21 = smov %s1225_s22  ;;  %s1610_s22 = smov %s1310_s28 }
 0x2b8   : > { %s1611_s23 = smov %s1298_s25  ;;  %22 = sbr.rel (!%p20_p2) target bundleno = 8 (0x8), region = 89 }
 0x2bf   :  { %812 = vsyncpa [#allocation4], 1 }
 0x2c0   :  { %814 = vsyncpa [#allocation4 + $0x1], 1 }
 0x2c1   :  { %815 = vsyncpa [#allocation7], 1 }
 0x2c2   :  { %816 = vsyncpa [#allocation5], 1 }
 0x2c3   :  { %818 = vsyncpa [#allocation5 + $0x1], 1 }

</bundles_post_ra>
